<compile_context>
chip_gen: v5e
topology: v5e:2x2
jax: 0.10.0
libtpu: 0.0.40
codegen_flags: <defaults>
</compile_context>

<pallas_src>
import functools

import jax
import jax.numpy as jnp
from jax.experimental import pallas as pl
from jax.experimental.pallas import tpu as pltpu


def cross_attention_kernel(x_ref, ctx_ref,
                           wq_ref, bq_ref, wk_ref, bk_ref, wv_ref, bv_ref,
                           wp_ref, bp_ref,
                           out_ref, attn_ref,
                           o_scr,
                           *, num_heads, mm_dtype):
    bt, N, C = x_ref.shape
    _, M, _ = ctx_ref.shape
    H = num_heads
    hd = C // H
    f32 = jnp.float32

    # ---- full-C q/k/v projections: one fat, lane-dense matmul each ----
    # (qk scale is pre-folded into Wq / bq by the wrapper)
    x2 = x_ref[...].reshape(bt * N, C).astype(mm_dtype)          # (btN, C)
    c2 = ctx_ref[...].reshape(bt * M, C).astype(mm_dtype)        # (btM, C)
    q2 = jnp.dot(x2, wq_ref[...], preferred_element_type=f32) + bq_ref[...]
    k2 = jnp.dot(c2, wk_ref[...], preferred_element_type=f32) + bk_ref[...]
    v2 = jnp.dot(c2, wv_ref[...], preferred_element_type=f32) + bv_ref[...]

    q3 = q2.reshape(bt, N, C).astype(mm_dtype)
    k3 = k2.reshape(bt, M, C).astype(mm_dtype)
    v3 = v2.reshape(bt, M, C).astype(mm_dtype)

    # TODO(synk): optional key-padding `mask` of the PyTorch module is not wired up
    # (demo / default path calls with mask=None).
    # TODO(synk): for production context lengths, tile the kv (M) axis with an inner
    # accumulation loop + online softmax (when the full attn matrix is not needed)
    # so the (N, M) f32 score tile stays inside the VMEM budget.

    # ---- attention per head: heads are only lane-slice *views* of q/k/v ----
    for h in range(H):                                           # static unroll (H small)
        sl = slice(h * hd, (h + 1) * hd)
        qh = q3[:, :, sl]                                        # (bt, N, hd)
        kh = k3[:, :, sl]                                        # (bt, M, hd)
        vh = v3[:, :, sl]                                        # (bt, M, hd)

        s = jnp.einsum('bnd,bmd->bnm', qh, kh, preferred_element_type=f32)
        s = s - jnp.max(s, axis=-1, keepdims=True)
        e = jnp.exp(s)                                           # f32 elementwise (v5e-safe)
        l = jnp.sum(e, axis=-1, keepdims=True)                   # (bt, N, 1)

        # Exact softmax for the returned attention matrix (rows sum to 1).
        attn_ref[:, h, :, :] = (e / l).astype(attn_ref.dtype)

        # Weighted values: normalize after the matmul with the EUP approx
        # reciprocal (small (bt, N, hd) multiply, VALU stays free).
        oh = jnp.einsum('bnm,bmd->bnd', e.astype(mm_dtype), vh,
                        preferred_element_type=f32)
        o_scr[:, :, sl] = oh * pl.reciprocal(l, approx=True)

    # ---- fused head-concat + single full-C output projection (depth C, not hd) ----
    o2 = o_scr[...].reshape(bt * N, C).astype(mm_dtype)
    y = jnp.dot(o2, wp_ref[...], preferred_element_type=f32) + bp_ref[...]
    out_ref[...] = y.reshape(bt, N, C).astype(out_ref.dtype)


def cross_attention_forward(x, context, params, num_heads, *,
                            qk_scale=None, mm_dtype=jnp.bfloat16,
                            attn_dtype=jnp.float32):
    """Returns (out, skip_x, attn) exactly like the PyTorch module's forward (mask=None)."""
    B, N, C = x.shape
    _, M, _ = context.shape
    H = num_heads
    hd = C // H
    scale = float(qk_scale) if qk_scale is not None else hd ** -0.5
    f32 = jnp.float32

    # --- wrapper-side weight prep: pre-transposed (C_in, C_out), bf16 weights,
    #     f32 biases; qk scale folded into Wq / bq (free). ---
    wq = (params["wq"].T * scale).astype(mm_dtype)
    wk = params["wk"].T.astype(mm_dtype)
    wv = params["wv"].T.astype(mm_dtype)
    wp = params["wproj"].T.astype(mm_dtype)
    bq = (params["bq"] * scale).reshape(1, C).astype(f32)
    bk = params["bk"].reshape(1, C).astype(f32)
    bv = params["bv"].reshape(1, C).astype(f32)
    bp = params["bproj"].reshape(1, C).astype(f32)

    act_b = jnp.dtype(x.dtype).itemsize
    mm_b = jnp.dtype(mm_dtype).itemsize
    attn_b = jnp.dtype(attn_dtype).itemsize

    def step_vmem_bytes(bt):
        """Rough per-grid-step VMEM bytes: 2x double-buffered I/O blocks + weights + temps."""
        btN, btM = bt * N, bt * M
        io = 2 * (btN * C * act_b                 # x block
                  + btM * C * act_b               # context block
                  + btN * C * act_b               # out block
                  + bt * H * N * M * attn_b)      # attn block
        wts = 2 * (4 * C * C * mm_b + 4 * C * 4)  # Wq/Wk/Wv/Wp + biases
        tmp = (btN + 2 * btM) * C * (4 + mm_b)    # q/k/v (f32 + bf16 views)
        tmp += 3 * bt * N * M * 4                 # s / e / p live per head
        tmp += btN * C * (4 + mm_b) + btN * C * 4  # o scratch + bf16 view + projected y
        return io + wts + tmp

    # --- bt selection: VMEM-byte aware (24 MiB budget, v7x-safe), and keep >= 2
    #     grid steps when B >= 2 so v7x's two TensorCores both get work. ---
    budget = 24 * 1024 * 1024
    min_steps = 2 if B >= 2 else 1
    bt = 1
    for cand in range(B, 0, -1):
        if B % cand or B // cand < min_steps:
            continue
        if step_vmem_bytes(cand) <= budget:
            bt = cand
            break
    grid = (B // bt,)

    est = step_vmem_bytes(bt)
    vmem_limit = None
    if est > 30 * 1024 * 1024:                    # raise scoped-VMEM limit only when needed
        vmem_limit = min(int(est * 1.25), 56 * 1024 * 1024)

    def const_spec(shape):
        # Constant-index weight/bias blocks (fetched once).  pipeline_mode=pl.Buffered(1)
        # would halve their VMEM footprint at production sizes; negligible here.
        nd = len(shape)
        return pl.BlockSpec(shape, lambda b, _nd=nd: (0,) * _nd)

    kernel = functools.partial(cross_attention_kernel, num_heads=H, mm_dtype=mm_dtype)

    # TODO(synk): at production M, pad M to a multiple of 128 (lane-dense attn stores)
    # and/or emit attn in bf16 to halve the dominant HBM writeback.
    out, attn = pl.pallas_call(
        kernel,
        out_shape=(jax.ShapeDtypeStruct((B, N, C), x.dtype),
                   jax.ShapeDtypeStruct((B, H, N, M), attn_dtype)),
        grid=grid,
        in_specs=[
            pl.BlockSpec((bt, N, C), lambda b: (b, 0, 0)),       # x
            pl.BlockSpec((bt, M, C), lambda b: (b, 0, 0)),       # context
            const_spec((C, C)), const_spec((1, C)),              # Wq (scale folded), bq
            const_spec((C, C)), const_spec((1, C)),              # Wk, bk
            const_spec((C, C)), const_spec((1, C)),              # Wv, bv
            const_spec((C, C)), const_spec((1, C)),              # Wproj, bproj
        ],
        out_specs=(pl.BlockSpec((bt, N, C), lambda b: (b, 0, 0)),
                   pl.BlockSpec((bt, H, N, M), lambda b: (b, 0, 0, 0))),
        scratch_shapes=[pltpu.VMEM((bt, N, C), jnp.float32)],    # head-fused o accumulator
        compiler_params=pltpu.CompilerParams(
            dimension_semantics=("parallel",),
            vmem_limit_bytes=vmem_limit),
    )(x, context, wq, bq, wk, bk, wv, bv, wp, bp)

    return out, x, attn


def ref_cross_attention(x, context, params, num_heads, qk_scale=None):
    """Pure-JAX reference mirroring the PyTorch CrossAttention forward (mask=None)."""
    B, N, C = x.shape
    _, M, _ = context.shape
    hd = C // num_heads
    scale = qk_scale if qk_scale is not None else hd ** -0.5
    q = (x @ params["wq"].T + params["bq"]).reshape(B, N, num_heads, hd).transpose(0, 2, 1, 3)
    k = (context @ params["wk"].T + params["bk"]).reshape(B, M, num_heads, hd).transpose(0, 2, 1, 3)
    v = (context @ params["wv"].T + params["bv"]).reshape(B, M, num_heads, hd).transpose(0, 2, 1, 3)
    attn = jnp.einsum("bhnd,bhmd->bhnm", q, k) * scale
    attn = jax.nn.softmax(attn, axis=-1)
    o = jnp.einsum("bhnm,bhmd->bhnd", attn, v).transpose(0, 2, 1, 3).reshape(B, N, C)
    o = o @ params["wproj"].T + params["bproj"]
    return o, x, attn


if __name__ == "__main__":
    # Small shapes consistent with the module: batch=2, query seq N=8,
    # context seq M=16, dim C=32, num_heads=4 (head_dim=8).
    B, N, M, C = 2, 8, 16, 32
    num_heads = 4
    f32 = jnp.float32

    key = jax.random.PRNGKey(0)
    ks = jax.random.split(key, 12)
    params = {
        "wq":    (0.05 * jax.random.normal(ks[0], (C, C))).astype(f32),
        "bq":    (0.05 * jax.random.normal(ks[1], (C,))).astype(f32),
        "wk":    (0.05 * jax.random.normal(ks[2], (C, C))).astype(f32),
        "bk":    (0.05 * jax.random.normal(ks[3], (C,))).astype(f32),
        "wv":    (0.05 * jax.random.normal(ks[4], (C, C))).astype(f32),
        "bv":    (0.05 * jax.random.normal(ks[5], (C,))).astype(f32),
        "wproj": (0.05 * jax.random.normal(ks[6], (C, C))).astype(f32),
        "bproj": (0.05 * jax.random.normal(ks[7], (C,))).astype(f32),
    }
    x = jax.random.normal(ks[8], (B, N, C), f32)
    context = jax.random.normal(ks[9], (B, M, C), f32)

    out, skip_x, attn = cross_attention_forward(x, context, params, num_heads)
    out, skip_x, attn = jax.block_until_ready((out, skip_x, attn))

    ref_out, ref_skip, ref_attn = ref_cross_attention(x, context, params, num_heads)
    # bf16 MXU operands (f32 accumulate) + approx reciprocal on the o path
    # -> tolerances loosened vs the pure-f32 reference.
    assert jnp.allclose(out, ref_out, rtol=1e-2, atol=1e-2), "proj output mismatch"
    assert jnp.allclose(attn, ref_attn, rtol=1e-2, atol=1e-2), "attn mismatch"
    assert jnp.allclose(skip_x, ref_skip), "skip_x mismatch"

    print("KERNEL_OK")
</pallas_src>

<mosaic_0001>
module attributes {stable_mosaic.version = 11 : i64} {
  func.func @cross_attention_kernel(%arg0: i32, %arg1: memref<1x8x32xf32, #tpu.memory_space<vmem>>, %arg2: memref<1x16x32xf32, #tpu.memory_space<vmem>>, %arg3: memref<32x32xbf16, #tpu.memory_space<vmem>>, %arg4: memref<1x32xf32, #tpu.memory_space<vmem>>, %arg5: memref<32x32xbf16, #tpu.memory_space<vmem>>, %arg6: memref<1x32xf32, #tpu.memory_space<vmem>>, %arg7: memref<32x32xbf16, #tpu.memory_space<vmem>>, %arg8: memref<1x32xf32, #tpu.memory_space<vmem>>, %arg9: memref<32x32xbf16, #tpu.memory_space<vmem>>, %arg10: memref<1x32xf32, #tpu.memory_space<vmem>>, %arg11: memref<1x8x32xf32, #tpu.memory_space<vmem>>, %arg12: memref<1x4x8x16xf32, #tpu.memory_space<vmem>>, %arg13: memref<1x8x32xf32, #tpu.memory_space<vmem>>) attributes {dimension_semantics = [#tpu.dimension_semantics<parallel>], iteration_bounds = array<i64: 2>, scalar_prefetch = 0 : i64, scratch_operands = 1 : i64, tpu.core_type = #tpu.core_type<tc>, window_params = [{transform_indices = @transform_0, window_bounds = array<i64: 1, 8, 32>}, {transform_indices = @transform_1, window_bounds = array<i64: 1, 16, 32>}, {pipeline_mode = #tpu.pipeline_mode<synchronous>, transform_indices = @transform_2, window_bounds = array<i64: 32, 32>}, {pipeline_mode = #tpu.pipeline_mode<synchronous>, transform_indices = @transform_3, window_bounds = array<i64: 1, 32>}, {pipeline_mode = #tpu.pipeline_mode<synchronous>, transform_indices = @transform_4, window_bounds = array<i64: 32, 32>}, {pipeline_mode = #tpu.pipeline_mode<synchronous>, transform_indices = @transform_5, window_bounds = array<i64: 1, 32>}, {pipeline_mode = #tpu.pipeline_mode<synchronous>, transform_indices = @transform_6, window_bounds = array<i64: 32, 32>}, {pipeline_mode = #tpu.pipeline_mode<synchronous>, transform_indices = @transform_7, window_bounds = array<i64: 1, 32>}, {pipeline_mode = #tpu.pipeline_mode<synchronous>, transform_indices = @transform_8, window_bounds = array<i64: 32, 32>}, {pipeline_mode = #tpu.pipeline_mode<synchronous>, transform_indices = @transform_9, window_bounds = array<i64: 1, 32>}, {transform_indices = @transform_10, window_bounds = array<i64: 1, 8, 32>}, {transform_indices = @transform_11, window_bounds = array<i64: 1, 4, 8, 16>}]} {
    %c0 = arith.constant 0 : index
    %c0_0 = arith.constant 0 : index
    %c0_1 = arith.constant 0 : index
    %0 = vector.load %arg1[%c0, %c0_0, %c0_1] : memref<1x8x32xf32, #tpu.memory_space<vmem>>, vector<1x8x32xf32>
    %1 = vector.shape_cast %0 : vector<1x8x32xf32> to vector<8x32xf32>
    %2 = arith.truncf %1 : vector<8x32xf32> to vector<8x32xbf16>
    %c0_2 = arith.constant 0 : index
    %c0_3 = arith.constant 0 : index
    %c0_4 = arith.constant 0 : index
    %3 = vector.load %arg2[%c0_2, %c0_3, %c0_4] : memref<1x16x32xf32, #tpu.memory_space<vmem>>, vector<1x16x32xf32>
    %4 = vector.shape_cast %3 : vector<1x16x32xf32> to vector<16x32xf32>
    %5 = arith.truncf %4 : vector<16x32xf32> to vector<16x32xbf16>
    %c0_5 = arith.constant 0 : index
    %c0_6 = arith.constant 0 : index
    %6 = vector.load %arg3[%c0_5, %c0_6] : memref<32x32xbf16, #tpu.memory_space<vmem>>, vector<32x32xbf16>
    %cst = arith.constant dense<0.000000e+00> : vector<8x32xf32>
    %7 = tpu.matmul %2, %6, %cst {dimension_numbers = #tpu.dot_dimension_numbers<[1], [0], [0], [1], [0, 0, 1, 1], [], []>} : vector<8x32xbf16>, vector<32x32xbf16>, vector<8x32xf32> -> vector<8x32xf32>
    %c0_7 = arith.constant 0 : index
    %c0_8 = arith.constant 0 : index
    %8 = vector.load %arg4[%c0_7, %c0_8] : memref<1x32xf32, #tpu.memory_space<vmem>>, vector<1x32xf32>
    %9 = vector.broadcast %8 : vector<1x32xf32> to vector<8x32xf32>
    %10 = arith.addf %7, %9 : vector<8x32xf32>
    %c0_9 = arith.constant 0 : index
    %c0_10 = arith.constant 0 : index
    %11 = vector.load %arg5[%c0_9, %c0_10] : memref<32x32xbf16, #tpu.memory_space<vmem>>, vector<32x32xbf16>
    %cst_11 = arith.constant dense<0.000000e+00> : vector<16x32xf32>
    %12 = tpu.matmul %5, %11, %cst_11 {dimension_numbers = #tpu.dot_dimension_numbers<[1], [0], [0], [1], [0, 0, 1, 1], [], []>} : vector<16x32xbf16>, vector<32x32xbf16>, vector<16x32xf32> -> vector<16x32xf32>
    %c0_12 = arith.constant 0 : index
    %c0_13 = arith.constant 0 : index
    %13 = vector.load %arg6[%c0_12, %c0_13] : memref<1x32xf32, #tpu.memory_space<vmem>>, vector<1x32xf32>
    %14 = vector.broadcast %13 : vector<1x32xf32> to vector<16x32xf32>
    %15 = arith.addf %12, %14 : vector<16x32xf32>
    %c0_14 = arith.constant 0 : index
    %c0_15 = arith.constant 0 : index
    %16 = vector.load %arg7[%c0_14, %c0_15] : memref<32x32xbf16, #tpu.memory_space<vmem>>, vector<32x32xbf16>
    %cst_16 = arith.constant dense<0.000000e+00> : vector<16x32xf32>
    %17 = tpu.matmul %5, %16, %cst_16 {dimension_numbers = #tpu.dot_dimension_numbers<[1], [0], [0], [1], [0, 0, 1, 1], [], []>} : vector<16x32xbf16>, vector<32x32xbf16>, vector<16x32xf32> -> vector<16x32xf32>
    %c0_17 = arith.constant 0 : index
    %c0_18 = arith.constant 0 : index
    %18 = vector.load %arg8[%c0_17, %c0_18] : memref<1x32xf32, #tpu.memory_space<vmem>>, vector<1x32xf32>
    %19 = vector.broadcast %18 : vector<1x32xf32> to vector<16x32xf32>
    %20 = arith.addf %17, %19 : vector<16x32xf32>
    %21 = vector.shape_cast %10 : vector<8x32xf32> to vector<1x8x32xf32>
    %22 = arith.truncf %21 : vector<1x8x32xf32> to vector<1x8x32xbf16>
    %23 = vector.shape_cast %15 : vector<16x32xf32> to vector<1x16x32xf32>
    %24 = arith.truncf %23 : vector<1x16x32xf32> to vector<1x16x32xbf16>
    %25 = vector.shape_cast %20 : vector<16x32xf32> to vector<1x16x32xf32>
    %26 = arith.truncf %25 : vector<1x16x32xf32> to vector<1x16x32xbf16>
    %27 = vector.extract_strided_slice %22 {offsets = [0, 0, 0], sizes = [1, 8, 8], strides = [1, 1, 1]} : vector<1x8x32xbf16> to vector<1x8x8xbf16>
    %28 = vector.extract_strided_slice %24 {offsets = [0, 0, 0], sizes = [1, 16, 8], strides = [1, 1, 1]} : vector<1x16x32xbf16> to vector<1x16x8xbf16>
    %29 = vector.extract_strided_slice %26 {offsets = [0, 0, 0], sizes = [1, 16, 8], strides = [1, 1, 1]} : vector<1x16x32xbf16> to vector<1x16x8xbf16>
    "tpu.trace_start"() <{level = 10 : i32, message = "bnd,bmd->bnm"}> : () -> ()
    %cst_19 = arith.constant dense<0.000000e+00> : vector<1x8x16xf32>
    %30 = tpu.matmul %27, %28, %cst_19 {dimension_numbers = #tpu.dot_dimension_numbers<[2], [2], [1], [1], [0, 0, 0, 1, 1, 1], [0], [0]>} : vector<1x8x8xbf16>, vector<1x16x8xbf16>, vector<1x8x16xf32> -> vector<1x8x16xf32>
    "tpu.trace_stop"() : () -> ()
    %cst_20 = arith.constant dense<0xFF800000> : vector<1x8xf32>
    %31 = vector.multi_reduction <maximumf>, %30, %cst_20 [2] : vector<1x8x16xf32> to vector<1x8xf32>
    %32 = vector.shape_cast %31 : vector<1x8xf32> to vector<1x8x1xf32>
    %33 = vector.broadcast %32 : vector<1x8x1xf32> to vector<1x8x16xf32>
    %34 = arith.subf %30, %33 : vector<1x8x16xf32>
    %35 = math.exp %34 : vector<1x8x16xf32>
    %cst_21 = arith.constant dense<0.000000e+00> : vector<1x8xf32>
    %36 = vector.multi_reduction <add>, %35, %cst_21 [2] : vector<1x8x16xf32> to vector<1x8xf32>
    %37 = vector.shape_cast %36 : vector<1x8xf32> to vector<1x8x1xf32>
    %38 = vector.broadcast %37 : vector<1x8x1xf32> to vector<1x8x16xf32>
    %39 = arith.divf %35, %38 : vector<1x8x16xf32>
    %c0_22 = arith.constant 0 : index
    %c0_23 = arith.constant 0 : index
    %c0_24 = arith.constant 0 : index
    %c0_25 = arith.constant 0 : index
    %40 = vector.load %arg12[%c0_22, %c0_23, %c0_24, %c0_25] : memref<1x4x8x16xf32, #tpu.memory_space<vmem>>, vector<1x1x8x16xf32>
    %41 = vector.shape_cast %40 : vector<1x1x8x16xf32> to vector<1x8x16xf32>
    %42 = vector.shape_cast %39 : vector<1x8x16xf32> to vector<1x1x8x16xf32>
    tpu.vector_store %arg12[%c0_22, %c0_23, %c0_24, %c0_25], %42 {strides = array<i32>} : memref<1x4x8x16xf32, #tpu.memory_space<vmem>>, vector<1x1x8x16xf32>,
    %43 = arith.truncf %35 : vector<1x8x16xf32> to vector<1x8x16xbf16>
    "tpu.trace_start"() <{level = 10 : i32, message = "bnm,bmd->bnd"}> : () -> ()
    %cst_26 = arith.constant dense<0.000000e+00> : vector<1x8x8xf32>
    %44 = tpu.matmul %43, %29, %cst_26 {dimension_numbers = #tpu.dot_dimension_numbers<[2], [1], [1], [2], [0, 0, 0, 1, 1, 2], [0], [0]>} : vector<1x8x16xbf16>, vector<1x16x8xbf16>, vector<1x8x8xf32> -> vector<1x8x8xf32>
    "tpu.trace_stop"() : () -> ()
    %45 = tpu.reciprocal %37 {approx = true} : vector<1x8x1xf32> -> vector<1x8x1xf32>
    %46 = vector.broadcast %45 : vector<1x8x1xf32> to vector<1x8x8xf32>
    %47 = arith.mulf %44, %46 : vector<1x8x8xf32>
    %c0_27 = arith.constant 0 : index
    %c0_28 = arith.constant 0 : index
    %c0_29 = arith.constant 0 : index
    %48 = vector.load %arg13[%c0_27, %c0_28, %c0_29] : memref<1x8x32xf32, #tpu.memory_space<vmem>>, vector<1x8x8xf32>
    tpu.vector_store %arg13[%c0_27, %c0_28, %c0_29], %47 {strides = array<i32>} : memref<1x8x32xf32, #tpu.memory_space<vmem>>, vector<1x8x8xf32>,
    %49 = vector.extract_strided_slice %22 {offsets = [0, 0, 8], sizes = [1, 8, 8], strides = [1, 1, 1]} : vector<1x8x32xbf16> to vector<1x8x8xbf16>
    %50 = vector.extract_strided_slice %24 {offsets = [0, 0, 8], sizes = [1, 16, 8], strides = [1, 1, 1]} : vector<1x16x32xbf16> to vector<1x16x8xbf16>
    %51 = vector.extract_strided_slice %26 {offsets = [0, 0, 8], sizes = [1, 16, 8], strides = [1, 1, 1]} : vector<1x16x32xbf16> to vector<1x16x8xbf16>
    "tpu.trace_start"() <{level = 10 : i32, message = "bnd,bmd->bnm"}> : () -> ()
    %cst_30 = arith.constant dense<0.000000e+00> : vector<1x8x16xf32>
    %52 = tpu.matmul %49, %50, %cst_30 {dimension_numbers = #tpu.dot_dimension_numbers<[2], [2], [1], [1], [0, 0, 0, 1, 1, 1], [0], [0]>} : vector<1x8x8xbf16>, vector<1x16x8xbf16>, vector<1x8x16xf32> -> vector<1x8x16xf32>
    "tpu.trace_stop"() : () -> ()
    %cst_31 = arith.constant dense<0xFF800000> : vector<1x8xf32>
    %53 = vector.multi_reduction <maximumf>, %52, %cst_31 [2] : vector<1x8x16xf32> to vector<1x8xf32>
    %54 = vector.shape_cast %53 : vector<1x8xf32> to vector<1x8x1xf32>
    %55 = vector.broadcast %54 : vector<1x8x1xf32> to vector<1x8x16xf32>
    %56 = arith.subf %52, %55 : vector<1x8x16xf32>
    %57 = math.exp %56 : vector<1x8x16xf32>
    %cst_32 = arith.constant dense<0.000000e+00> : vector<1x8xf32>
    %58 = vector.multi_reduction <add>, %57, %cst_32 [2] : vector<1x8x16xf32> to vector<1x8xf32>
    %59 = vector.shape_cast %58 : vector<1x8xf32> to vector<1x8x1xf32>
    %60 = vector.broadcast %59 : vector<1x8x1xf32> to vector<1x8x16xf32>
    %61 = arith.divf %57, %60 : vector<1x8x16xf32>
    %c0_33 = arith.constant 0 : index
    %c1 = arith.constant 1 : index
    %c0_34 = arith.constant 0 : index
    %c0_35 = arith.constant 0 : index
    %62 = vector.load %arg12[%c0_33, %c1, %c0_34, %c0_35] : memref<1x4x8x16xf32, #tpu.memory_space<vmem>>, vector<1x1x8x16xf32>
    %63 = vector.shape_cast %62 : vector<1x1x8x16xf32> to vector<1x8x16xf32>
    %64 = vector.shape_cast %61 : vector<1x8x16xf32> to vector<1x1x8x16xf32>
    tpu.vector_store %arg12[%c0_33, %c1, %c0_34, %c0_35], %64 {strides = array<i32>} : memref<1x4x8x16xf32, #tpu.memory_space<vmem>>, vector<1x1x8x16xf32>,
    %65 = arith.truncf %57 : vector<1x8x16xf32> to vector<1x8x16xbf16>
    "tpu.trace_start"() <{level = 10 : i32, message = "bnm,bmd->bnd"}> : () -> ()
    %cst_36 = arith.constant dense<0.000000e+00> : vector<1x8x8xf32>
    %66 = tpu.matmul %65, %51, %cst_36 {dimension_numbers = #tpu.dot_dimension_numbers<[2], [1], [1], [2], [0, 0, 0, 1, 1, 2], [0], [0]>} : vector<1x8x16xbf16>, vector<1x16x8xbf16>, vector<1x8x8xf32> -> vector<1x8x8xf32>
    "tpu.trace_stop"() : () -> ()
    %67 = tpu.reciprocal %59 {approx = true} : vector<1x8x1xf32> -> vector<1x8x1xf32>
    %68 = vector.broadcast %67 : vector<1x8x1xf32> to vector<1x8x8xf32>
    %69 = arith.mulf %66, %68 : vector<1x8x8xf32>
    %c0_37 = arith.constant 0 : index
    %c0_38 = arith.constant 0 : index
    %c8 = arith.constant 8 : index
    %70 = vector.load %arg13[%c0_37, %c0_38, %c8] : memref<1x8x32xf32, #tpu.memory_space<vmem>>, vector<1x8x8xf32>
    tpu.vector_store %arg13[%c0_37, %c0_38, %c8], %69 {strides = array<i32>} : memref<1x8x32xf32, #tpu.memory_space<vmem>>, vector<1x8x8xf32>,
    %71 = vector.extract_strided_slice %22 {offsets = [0, 0, 16], sizes = [1, 8, 8], strides = [1, 1, 1]} : vector<1x8x32xbf16> to vector<1x8x8xbf16>
    %72 = vector.extract_strided_slice %24 {offsets = [0, 0, 16], sizes = [1, 16, 8], strides = [1, 1, 1]} : vector<1x16x32xbf16> to vector<1x16x8xbf16>
    %73 = vector.extract_strided_slice %26 {offsets = [0, 0, 16], sizes = [1, 16, 8], strides = [1, 1, 1]} : vector<1x16x32xbf16> to vector<1x16x8xbf16>
    "tpu.trace_start"() <{level = 10 : i32, message = "bnd,bmd->bnm"}> : () -> ()
    %cst_39 = arith.constant dense<0.000000e+00> : vector<1x8x16xf32>
    %74 = tpu.matmul %71, %72, %cst_39 {dimension_numbers = #tpu.dot_dimension_numbers<[2], [2], [1], [1], [0, 0, 0, 1, 1, 1], [0], [0]>} : vector<1x8x8xbf16>, vector<1x16x8xbf16>, vector<1x8x16xf32> -> vector<1x8x16xf32>
    "tpu.trace_stop"() : () -> ()
    %cst_40 = arith.constant dense<0xFF800000> : vector<1x8xf32>
    %75 = vector.multi_reduction <maximumf>, %74, %cst_40 [2] : vector<1x8x16xf32> to vector<1x8xf32>
    %76 = vector.shape_cast %75 : vector<1x8xf32> to vector<1x8x1xf32>
    %77 = vector.broadcast %76 : vector<1x8x1xf32> to vector<1x8x16xf32>
    %78 = arith.subf %74, %77 : vector<1x8x16xf32>
    %79 = math.exp %78 : vector<1x8x16xf32>
    %cst_41 = arith.constant dense<0.000000e+00> : vector<1x8xf32>
    %80 = vector.multi_reduction <add>, %79, %cst_41 [2] : vector<1x8x16xf32> to vector<1x8xf32>
    %81 = vector.shape_cast %80 : vector<1x8xf32> to vector<1x8x1xf32>
    %82 = vector.broadcast %81 : vector<1x8x1xf32> to vector<1x8x16xf32>
    %83 = arith.divf %79, %82 : vector<1x8x16xf32>
    %c0_42 = arith.constant 0 : index
    %c2 = arith.constant 2 : index
    %c0_43 = arith.constant 0 : index
    %c0_44 = arith.constant 0 : index
    %84 = vector.load %arg12[%c0_42, %c2, %c0_43, %c0_44] : memref<1x4x8x16xf32, #tpu.memory_space<vmem>>, vector<1x1x8x16xf32>
    %85 = vector.shape_cast %84 : vector<1x1x8x16xf32> to vector<1x8x16xf32>
    %86 = vector.shape_cast %83 : vector<1x8x16xf32> to vector<1x1x8x16xf32>
    tpu.vector_store %arg12[%c0_42, %c2, %c0_43, %c0_44], %86 {strides = array<i32>} : memref<1x4x8x16xf32, #tpu.memory_space<vmem>>, vector<1x1x8x16xf32>,
    %87 = arith.truncf %79 : vector<1x8x16xf32> to vector<1x8x16xbf16>
    "tpu.trace_start"() <{level = 10 : i32, message = "bnm,bmd->bnd"}> : () -> ()
    %cst_45 = arith.constant dense<0.000000e+00> : vector<1x8x8xf32>
    %88 = tpu.matmul %87, %73, %cst_45 {dimension_numbers = #tpu.dot_dimension_numbers<[2], [1], [1], [2], [0, 0, 0, 1, 1, 2], [0], [0]>} : vector<1x8x16xbf16>, vector<1x16x8xbf16>, vector<1x8x8xf32> -> vector<1x8x8xf32>
    "tpu.trace_stop"() : () -> ()
    %89 = tpu.reciprocal %81 {approx = true} : vector<1x8x1xf32> -> vector<1x8x1xf32>
    %90 = vector.broadcast %89 : vector<1x8x1xf32> to vector<1x8x8xf32>
    %91 = arith.mulf %88, %90 : vector<1x8x8xf32>
    %c0_46 = arith.constant 0 : index
    %c0_47 = arith.constant 0 : index
    %c16 = arith.constant 16 : index
    %92 = vector.load %arg13[%c0_46, %c0_47, %c16] : memref<1x8x32xf32, #tpu.memory_space<vmem>>, vector<1x8x8xf32>
    tpu.vector_store %arg13[%c0_46, %c0_47, %c16], %91 {strides = array<i32>} : memref<1x8x32xf32, #tpu.memory_space<vmem>>, vector<1x8x8xf32>,
    %93 = vector.extract_strided_slice %22 {offsets = [0, 0, 24], sizes = [1, 8, 8], strides = [1, 1, 1]} : vector<1x8x32xbf16> to vector<1x8x8xbf16>
    %94 = vector.extract_strided_slice %24 {offsets = [0, 0, 24], sizes = [1, 16, 8], strides = [1, 1, 1]} : vector<1x16x32xbf16> to vector<1x16x8xbf16>
    %95 = vector.extract_strided_slice %26 {offsets = [0, 0, 24], sizes = [1, 16, 8], strides = [1, 1, 1]} : vector<1x16x32xbf16> to vector<1x16x8xbf16>
    "tpu.trace_start"() <{level = 10 : i32, message = "bnd,bmd->bnm"}> : () -> ()
    %cst_48 = arith.constant dense<0.000000e+00> : vector<1x8x16xf32>
    %96 = tpu.matmul %93, %94, %cst_48 {dimension_numbers = #tpu.dot_dimension_numbers<[2], [2], [1], [1], [0, 0, 0, 1, 1, 1], [0], [0]>} : vector<1x8x8xbf16>, vector<1x16x8xbf16>, vector<1x8x16xf32> -> vector<1x8x16xf32>
    "tpu.trace_stop"() : () -> ()
    %cst_49 = arith.constant dense<0xFF800000> : vector<1x8xf32>
    %97 = vector.multi_reduction <maximumf>, %96, %cst_49 [2] : vector<1x8x16xf32> to vector<1x8xf32>
    %98 = vector.shape_cast %97 : vector<1x8xf32> to vector<1x8x1xf32>
    %99 = vector.broadcast %98 : vector<1x8x1xf32> to vector<1x8x16xf32>
    %100 = arith.subf %96, %99 : vector<1x8x16xf32>
    %101 = math.exp %100 : vector<1x8x16xf32>
    %cst_50 = arith.constant dense<0.000000e+00> : vector<1x8xf32>
    %102 = vector.multi_reduction <add>, %101, %cst_50 [2] : vector<1x8x16xf32> to vector<1x8xf32>
    %103 = vector.shape_cast %102 : vector<1x8xf32> to vector<1x8x1xf32>
    %104 = vector.broadcast %103 : vector<1x8x1xf32> to vector<1x8x16xf32>
    %105 = arith.divf %101, %104 : vector<1x8x16xf32>
    %c0_51 = arith.constant 0 : index
    %c3 = arith.constant 3 : index
    %c0_52 = arith.constant 0 : index
    %c0_53 = arith.constant 0 : index
    %106 = vector.load %arg12[%c0_51, %c3, %c0_52, %c0_53] : memref<1x4x8x16xf32, #tpu.memory_space<vmem>>, vector<1x1x8x16xf32>
    %107 = vector.shape_cast %106 : vector<1x1x8x16xf32> to vector<1x8x16xf32>
    %108 = vector.shape_cast %105 : vector<1x8x16xf32> to vector<1x1x8x16xf32>
    tpu.vector_store %arg12[%c0_51, %c3, %c0_52, %c0_53], %108 {strides = array<i32>} : memref<1x4x8x16xf32, #tpu.memory_space<vmem>>, vector<1x1x8x16xf32>,
    %109 = arith.truncf %101 : vector<1x8x16xf32> to vector<1x8x16xbf16>
    "tpu.trace_start"() <{level = 10 : i32, message = "bnm,bmd->bnd"}> : () -> ()
    %cst_54 = arith.constant dense<0.000000e+00> : vector<1x8x8xf32>
    %110 = tpu.matmul %109, %95, %cst_54 {dimension_numbers = #tpu.dot_dimension_numbers<[2], [1], [1], [2], [0, 0, 0, 1, 1, 2], [0], [0]>} : vector<1x8x16xbf16>, vector<1x16x8xbf16>, vector<1x8x8xf32> -> vector<1x8x8xf32>
    "tpu.trace_stop"() : () -> ()
    %111 = tpu.reciprocal %103 {approx = true} : vector<1x8x1xf32> -> vector<1x8x1xf32>
    %112 = vector.broadcast %111 : vector<1x8x1xf32> to vector<1x8x8xf32>
    %113 = arith.mulf %110, %112 : vector<1x8x8xf32>
    %c0_55 = arith.constant 0 : index
    %c0_56 = arith.constant 0 : index
    %c24 = arith.constant 24 : index
    %114 = vector.load %arg13[%c0_55, %c0_56, %c24] : memref<1x8x32xf32, #tpu.memory_space<vmem>>, vector<1x8x8xf32>
    tpu.vector_store %arg13[%c0_55, %c0_56, %c24], %113 {strides = array<i32>} : memref<1x8x32xf32, #tpu.memory_space<vmem>>, vector<1x8x8xf32>,
    %c0_57 = arith.constant 0 : index
    %c0_58 = arith.constant 0 : index
    %c0_59 = arith.constant 0 : index
    %115 = vector.load %arg13[%c0_57, %c0_58, %c0_59] : memref<1x8x32xf32, #tpu.memory_space<vmem>>, vector<1x8x32xf32>
    %116 = vector.shape_cast %115 : vector<1x8x32xf32> to vector<8x32xf32>
    %117 = arith.truncf %116 : vector<8x32xf32> to vector<8x32xbf16>
    %c0_60 = arith.constant 0 : index
    %c0_61 = arith.constant 0 : index
    %118 = vector.load %arg9[%c0_60, %c0_61] : memref<32x32xbf16, #tpu.memory_space<vmem>>, vector<32x32xbf16>
    %cst_62 = arith.constant dense<0.000000e+00> : vector<8x32xf32>
    %119 = tpu.matmul %117, %118, %cst_62 {dimension_numbers = #tpu.dot_dimension_numbers<[1], [0], [0], [1], [0, 0, 1, 1], [], []>} : vector<8x32xbf16>, vector<32x32xbf16>, vector<8x32xf32> -> vector<8x32xf32>
    %c0_63 = arith.constant 0 : index
    %c0_64 = arith.constant 0 : index
    %120 = vector.load %arg10[%c0_63, %c0_64] : memref<1x32xf32, #tpu.memory_space<vmem>>, vector<1x32xf32>
    %121 = vector.broadcast %120 : vector<1x32xf32> to vector<8x32xf32>
    %122 = arith.addf %119, %121 : vector<8x32xf32>
    %123 = vector.shape_cast %122 : vector<8x32xf32> to vector<1x8x32xf32>
    %c0_65 = arith.constant 0 : index
    %c0_66 = arith.constant 0 : index
    %c0_67 = arith.constant 0 : index
    %124 = vector.load %arg11[%c0_65, %c0_66, %c0_67] : memref<1x8x32xf32, #tpu.memory_space<vmem>>, vector<1x8x32xf32>
    tpu.vector_store %arg11[%c0_65, %c0_66, %c0_67], %123 {strides = array<i32>} : memref<1x8x32xf32, #tpu.memory_space<vmem>>, vector<1x8x32xf32>,
    return
  }
  func.func @transform_0(%arg0: i32) -> (i32, i32, i32) {
    %c0_i32 = arith.constant 0 : i32
    %c0_i32_0 = arith.constant 0 : i32
    %c0_i32_1 = arith.constant 0 : i32
    return %arg0, %c0_i32, %c0_i32_0 : i32, i32, i32
  }
  func.func @transform_1(%arg0: i32) -> (i32, i32, i32) {
    %c0_i32 = arith.constant 0 : i32
    %c0_i32_0 = arith.constant 0 : i32
    %c0_i32_1 = arith.constant 0 : i32
    return %arg0, %c0_i32, %c0_i32_0 : i32, i32, i32
  }
  func.func @transform_2(%arg0: i32) -> (i32, i32) {
    %c0_i32 = arith.constant 0 : i32
    %c0_i32_0 = arith.constant 0 : i32
    %c0_i32_1 = arith.constant 0 : i32
    return %c0_i32, %c0_i32_0 : i32, i32
  }
  func.func @transform_3(%arg0: i32) -> (i32, i32) {
    %c0_i32 = arith.constant 0 : i32
    %c0_i32_0 = arith.constant 0 : i32
    %c0_i32_1 = arith.constant 0 : i32
    return %c0_i32, %c0_i32_0 : i32, i32
  }
  func.func @transform_4(%arg0: i32) -> (i32, i32) {
    %c0_i32 = arith.constant 0 : i32
    %c0_i32_0 = arith.constant 0 : i32
    %c0_i32_1 = arith.constant 0 : i32
    return %c0_i32, %c0_i32_0 : i32, i32
  }
  func.func @transform_5(%arg0: i32) -> (i32, i32) {
    %c0_i32 = arith.constant 0 : i32
    %c0_i32_0 = arith.constant 0 : i32
    %c0_i32_1 = arith.constant 0 : i32
    return %c0_i32, %c0_i32_0 : i32, i32
  }
  func.func @transform_6(%arg0: i32) -> (i32, i32) {
    %c0_i32 = arith.constant 0 : i32
    %c0_i32_0 = arith.constant 0 : i32
    %c0_i32_1 = arith.constant 0 : i32
    return %c0_i32, %c0_i32_0 : i32, i32
  }
  func.func @transform_7(%arg0: i32) -> (i32, i32) {
    %c0_i32 = arith.constant 0 : i32
    %c0_i32_0 = arith.constant 0 : i32
    %c0_i32_1 = arith.constant 0 : i32
    return %c0_i32, %c0_i32_0 : i32, i32
  }
  func.func @transform_8(%arg0: i32) -> (i32, i32) {
    %c0_i32 = arith.constant 0 : i32
    %c0_i32_0 = arith.constant 0 : i32
    %c0_i32_1 = arith.constant 0 : i32
    return %c0_i32, %c0_i32_0 : i32, i32
  }
  func.func @transform_9(%arg0: i32) -> (i32, i32) {
    %c0_i32 = arith.constant 0 : i32
    %c0_i32_0 = arith.constant 0 : i32
    %c0_i32_1 = arith.constant 0 : i32
    return %c0_i32, %c0_i32_0 : i32, i32
  }
  func.func @transform_10(%arg0: i32) -> (i32, i32, i32) {
    %c0_i32 = arith.constant 0 : i32
    %c0_i32_0 = arith.constant 0 : i32
    %c0_i32_1 = arith.constant 0 : i32
    return %arg0, %c0_i32, %c0_i32_0 : i32, i32, i32
  }
  func.func @transform_11(%arg0: i32) -> (i32, i32, i32, i32) {
    %c0_i32 = arith.constant 0 : i32
    %c0_i32_0 = arith.constant 0 : i32
    %c0_i32_1 = arith.constant 0 : i32
    %c0_i32_2 = arith.constant 0 : i32
    return %arg0, %c0_i32, %c0_i32_0, %c0_i32_1 : i32, i32, i32, i32
  }
}

</mosaic_0001>

<bundles_post_ra>
// kernel: tpu_custom_call.1
= control target key start
LH: loop header
LB: loop body
LE: loop exit
PB: predicated region body
PF: predicated region fallthrough
CT: control target
= control target key end

     0   :  { %s2077_s0 = inlined_call_operand.hbm [shape: f32[2,8,32], index: 0, kind: input, shape index: {}]   ;;  %s2078_s1 = inlined_call_operand.hbm [shape: f32[2,16,32], index: 1, kind: input, shape index: {}]   ;;  %s2079_s2 = inlined_call_operand.hbm [shape: bf16[32,32], index: 2, kind: input, shape index: {}]   ;;  %s2080_s3 = inlined_call_operand.vmem [shape: f32[1,32], index: 3, kind: input, shape index: {}]   ;;  %s2081_s4 = inlined_call_operand.hbm [shape: bf16[32,32], index: 4, kind: input, shape index: {}]   ;;  %s2082_s5 = inlined_call_operand.vmem [shape: f32[1,32], index: 5, kind: input, shape index: {}]   ;;  %s2083_s6 = inlined_call_operand.hbm [shape: bf16[32,32], index: 6, kind: input, shape index: {}]   ;;  %s2084_s7 = inlined_call_operand.vmem [shape: f32[1,32], index: 7, kind: input, shape index: {}]   ;;  %s2085_s8 = inlined_call_operand.hbm [shape: bf16[32,32], index: 8, kind: input, shape index: {}]   ;;  %s2086_s9 = inlined_call_operand.vmem [shape: f32[1,32], index: 9, kind: input, shape index: {}]   ;;  %s2087_s10 = inlined_call_operand.hbm [shape: f32[2,8,32], index: 10, kind: output, shape index: {0}]   ;;  %s2088_s11 = inlined_call_operand.hbm [shape: f32[2,4,8,16], index: 11, kind: output, shape index: {1}]  }
   0x1   :  { %2094 = sst [smem:[#allocation29_spill]] %s2079_s2 }
   0x2   :  { %2095 = sst [smem:[#allocation30_spill]] %s2081_s4 }
   0x3   :  { %2096 = sst [smem:[#allocation31_spill]] %s2083_s6 }
   0x4   :  { %2097 = sst [smem:[#allocation32_spill]] %s2085_s8 }
   0x5   :  { %2098 = sst [smem:[#allocation33_spill]] %s2086_s9 }
   0x6   :  { %17 = vsyncpa [#allocation4], 0 }
   0x7   :  { %19 = vsyncpa [#allocation4 + $0x1], 0 }
   0x8   :  { %20 = vsyncpa [#allocation7], 0 }
   0x9   :  { %22 = vsyncpa [#allocation7 + $0x1], 0 }
   0xa   :  { %23 = vsyncpa [#allocation10], 0 }
   0xb   :  { %24 = vsyncpa [#allocation13], 0 }
   0xc   :  { %25 = vsyncpa [#allocation5], 0 }
   0xd   :  { %27 = vsyncpa [#allocation5 + $0x1], 0 }
   0xe   :  { %28 = vsyncpa [#allocation16], 0 }
   0xf   :  { %30 = vsyncpa [#allocation16 + $0x1], 0  ;;  %s1778_s17 = smov 0   ;;  %s1780_s18 = smov 0  }
  0x10   :  { %s1782_s19 = smov 0   ;;  %s1784_s20 = smov 0  }
  0x11 LB: > { %2099 = sst [smem:[#allocation24_spill]] %s1689_s17  ;;  %s1802_s24 = sadd.s32 4294967295, %s1701_s20   ;;  %s1701_s20 = sphi %s1784_s20, %s2119_s20   ;;  %s1697_s19 = sphi %s1782_s19, %s2121_s19   ;;  %s1693_s18 = sphi %s1780_s18, %s2123_s18   ;;  %s1689_s17 = sphi %s1778_s17, %s2122_s17  }
  0x12   : > { %2100 = sst [smem:[#allocation25_spill]] %s1697_s19  ;;  %p1195_p0 = scmp.ge.s32.totalorder %s1701_s20, 1 }
  0x13   : > { %s2101_s2 = sld [smem:[#allocation29_spill]]  ;;  %p57_p1 = scmp.eq.s32.totalorder %s1802_s24, 0 }
  0x14   : > { %p313_p2 = scmp.lt.s32.totalorder %s1701_s20, 3  ;;  %s1703_s26 = smov [#allocation8]  }
  0x15   : > { %s326_s27 = sshll.u32 %s1703_s26, 4  ;;  %s2103_s4 = sld [smem:[#allocation30_spill]]  ;;  %s327_s27 = int_to_ptr.vmem [resolvable:$true] %s326_s27 }
  0x16   : > { %p1807_p3 = pnand %p1195_p0, %p313_p2  ;;  %s2105_s6 = sld [smem:[#allocation31_spill]] }
  0x17   : > { %s1704_s16 = smov [#allocation9]   ;;  %s1705_s22 = smov 64  }
  0x18   : > { %p1303_p4 = pneg %p1807_p3  ;;  %s343_s21 = sshll.u32 %s1704_s16, 4  ;;  %s344_s21 = int_to_ptr.vmem [resolvable:$true] %s343_s21 }
  0x19   : > { %s324_s23 = sshll.u32 %s2101_s2, 4  ;;  %s1706_s26 = smov 4   ;;  %s325_s23 = int_to_ptr.hbm [resolvable:$true] %s324_s23 }
  0x1a   : > { %p1819_p6 = pnand %p1303_p4, %p57_p1  ;;  %s2106_s8 = sld [smem:[#allocation32_spill]] }
  0x1b   : > { %s341_s30 = sshll.u32 %s2103_s4, 4  ;;  %s1707_s14 = smov [#allocation11]   ;;  %s342_s30 = int_to_ptr.hbm [resolvable:$true] %s341_s30 }
  0x1c   : > { %s358_s15 = sshll.u32 %s2105_s6, 4  ;;  %s360_s16 = sshll.u32 %s1707_s14, 4  ;;  %s359_s15 = int_to_ptr.hbm [resolvable:$true] %s358_s15  ;;  %s361_s16 = int_to_ptr.vmem [resolvable:$true] %s360_s16 }
  0x1d   : > { %1306 = dma.hbm_to_vmem [thread:$0]  (!%p1819_p6), %s325_s23, 256, %s327_s27, [#allocation7], %s1705_s22, %s1705_s22, %s1706_s26  }
  0x1e   : > { %1309 = dma.hbm_to_vmem [thread:$0]  (!%p1819_p6), %s342_s30, 256, %s344_s21, [#allocation10], %s1705_s22, %s1705_s22, %s1706_s26  }
  0x1f   : > { %1312 = dma.hbm_to_vmem [thread:$0]  (!%p1819_p6), %s359_s15, 256, %s361_s16, [#allocation10], %s1705_s22, %s1705_s22, %s1706_s26  }
  0x20   : > { %s375_s13 = sshll.u32 %s2106_s8, 4  ;;  %s1708_s23 = smov [#allocation12]   ;;  %s376_s13 = int_to_ptr.hbm [resolvable:$true] %s375_s13 }
  0x21   : > { %s377_s27 = sshll.u32 %s1708_s23, 4  ;;  %s1194_s30 = sadd.s32 4294967294, %s1701_s20   ;;  %s378_s27 = int_to_ptr.vmem [resolvable:$true] %s377_s27 }
  0x22   : > { %1315 = dma.hbm_to_vmem [thread:$0]  (!%p1819_p6), %s376_s13, 256, %s378_s27, [#allocation13], %s1705_s22, %s1705_s22, %s1706_s26  }
  0x23   : > { %s1839_s21 = sadd.s32 1, %s1701_s20   ;;  %s43_s29 = sadd.s32 1, %s1697_s19 }
  0x24   : > { %2107 = sst [smem:[#allocation26_spill]] %s1839_s21  ;;  %s40_s28 = ssub.s32 %s1701_s20, %s1839_s21 }
  0x25   : > { %p41_p7 = scmp.eq.s32.totalorder %s40_s28, 0  ;;  %p50_p8 = scmp.ne.s32.totalorder %s1697_s19, %s1693_s18 }
  0x26   : > { %p51_p9 = scmp.eq.s32.totalorder %s1701_s20, 0  ;;  %p56_p10 = scmp.ne.s32.totalorder %s1693_s18, %s1689_s17 }
  0x27   : > { %s1850_s15 = scalar_select %p41_p7, %s1697_s19, %s43_s29  }
  0x28   : > { %p1852_p11 = por %p51_p9, %p50_p8  ;;  %p1858_p12 = por %p57_p1, %p56_p10 }
  0x29   : > { %2108 = sst [smem:[#allocation27_spill]] %s1850_s15  ;;  %p274_p13 = scmp.eq.s32.totalorder %s1802_s24, 1 }
  0x2a   : > { %p280_p0 = scmp.eq.s32.totalorder %s1194_s30, 1  ;;  %p1334_p2 = scmp.lt.s32.totalorder %s1701_s20, 2 }
  0x2b   : > { %s1865_s22 = sand.u32 1, %s1697_s19   ;;  %p1867_p4 = por %p274_p13, %p50_p8 }
  0x2c   : > { %p1871_p6 = por %p280_p0, %p56_p10  ;;  %s1201_s16 = sshll.u32 %s1865_s22, 3 }
  0x2d   : > { %s1202_s23 = sshll.u32 %s1701_s20, 3  ;;  %s398_s29 = scalar_lea.vmem [#allocation3], %s1201_s16 }
  0x2e   : > { %s2112_s13 = scalar_select %p1871_p6, 1, 0 }
  0x2f   : > { %s402_s30 = scalar_lea.hbm %s2077_s0, %s1202_s23  ;;  %s406_s2 = sshll.u32 %s398_s29, 4  ;;  %s407_s2 = int_to_ptr.vmem [resolvable:$true] %s406_s2 }
  0x30   : > { %2113 = sst [smem:[#allocation28_spill]] %s2112_s13  ;;  %s404_s4 = sshll.u32 %s402_s30, 4  ;;  %s405_s4 = int_to_ptr.hbm [resolvable:$true] %s404_s4 }
  0x31   : > { %p1882_p7 = pnand %p1334_p2, %p1852_p11  ;;  %s1203_s8 = sshll.u32 %s1865_s22, 4 }
  0x32   : > { %s413_s15 = sand.u32 1, %s1701_s20   ;;  %s395_s19 = scalar_lea.sflag [#allocation4], %s1865_s22 }
  0x33   : > { %s1527_s21 = sshra.s32 %s405_s4, 4  ;;  %p1531_p9 = pneg %p1882_p7  ;;  %s1528_s21 = int_to_ptr.hbm [resolvable:$true] %s1527_s21 }
  0x34   : > { %s1529_s13 = scalar_lea.hbm %s1528_s21, 8  ;;  %s1534_s23 = scalar_lea.hbm %s2077_s0, 16 }
  0x35   : > { %p1530_p8 = scmp.ne.s32.totalorder %s1528_s21, %s1529_s13  ;;  %p1535_p11 = scmp.lt.s32.totalorder %s1528_s21, %s2077_s0 }
  0x36   : > { %p1536_p0 = scmp.lt.s32.totalorder %s1534_s23, %s1529_s13 }
  0x37   : > { %p1532_p10 = pnand %p1531_p9, %p1530_p8 }
  0x38   : > { %p1537_p2 = por %p1536_p0, %p1535_p11 }
  0x39   : > { %p1533_p13 = pneg %p1532_p10 }
  0x3b   : > { %p1538_p5 = pnand %p1537_p2, %p1533_p13 }
  0x3d   : > { %1541 = shalt.err (!%p1538_p5)
}
  0x3e   : > { %1319 = dma.hbm_to_vmem [thread:$0]  (!%p1882_p7), %s405_s4, 128, %s407_s2, %s395_s19  }
  0x3f   : > { %s417_s22 = scalar_lea.vmem [#allocation6], %s1203_s8  ;;  %s1269_s29 = sshll.u32 %s1701_s20, 4 }
  0x40   : > { %s425_s30 = sshll.u32 %s417_s22, 4  ;;  %s422_s16 = scalar_lea.hbm %s2078_s1, %s1269_s29  ;;  %s426_s30 = int_to_ptr.vmem [resolvable:$true] %s425_s30 }
  0x41   : > { %s423_s9 = sshll.u32 %s422_s16, 4  ;;  %s414_s21 = scalar_lea.sflag [#allocation7], %s413_s15  ;;  %s424_s9 = int_to_ptr.hbm [resolvable:$true] %s423_s9 }
  0x42   : > { %s1557_s13 = sshra.s32 %s424_s9, 4  ;;  %s1564_s8 = scalar_lea.hbm %s2078_s1, 32  ;;  %s1558_s13 = int_to_ptr.hbm [resolvable:$true] %s1557_s13 }
  0x43   : > { %s1559_s23 = scalar_lea.hbm %s1558_s13, 16  ;;  %p1565_p13 = scmp.lt.s32.totalorder %s1558_s13, %s2078_s1 }
  0x44   : > { %p1560_p5 = scmp.ne.s32.totalorder %s1558_s13, %s1559_s23  ;;  %p1566_p11 = scmp.lt.s32.totalorder %s1564_s8, %s1559_s23 }
  0x46   : > { %p1562_p8 = pnand %p1560_p5, %p1531_p9  ;;  %p1567_p0 = por %p1566_p11, %p1565_p13 }
  0x48   : > { %p1563_p10 = pneg %p1562_p8 }
  0x4a   : > { %p1568_p2 = pnand %p1567_p0, %p1563_p10 }
  0x4c   : > { %1571 = shalt.err (!%p1568_p2)
}
  0x4d   : > { %s1709_s17 = smov 128   ;;  %s1710_s15 = smov 8  }
  0x4e   : > { %1322 = dma.hbm_to_vmem [thread:$0]  (!%p1882_p7), %s424_s9, 256, %s426_s30, %s414_s21, %s1709_s17, %s1709_s17, %s1710_s15  }
  0x4f   : > { %437 = sbr.rel (%p1807_p3) target bundleno = 1031 (0x407), region = 60  ;;  %s1920_s28 = sand.u32 (!%p1807_p3), 1, %s1693_s18  }
  0x50   : > { %s1207_s22 = sshll.u32 (!%p1807_p3), %s1920_s28, 3  ;;  %s440_s29 = scalar_lea.sflag (!%p1807_p3), [#allocation4], %s1920_s28 }
  0x51   : > { %s443_s14 = scalar_lea.vmem (!%p1807_p3), [#allocation3], %s1207_s22 }
  0x54   : > { %1660 = dma.done.wait (%p1858_p12), %s440_s29, 128  }
  0x55   : > { %1662 = vsyncadd (%p1858_p12), %s440_s29, 4294967168  ;;  %s449_s6 = sand.u32 1, %s1802_s24   ;;  %s1208_s9 = sshll.u32 %s1920_s28, 4 }
  0x56   : > { %s450_s25 = scalar_lea.sflag [#allocation7], %s449_s6  ;;  %s453_s30 = scalar_lea.vmem [#allocation6], %s1208_s9 }
  0x57   : > { %1664 = dma.done.wait (%p1858_p12), %s450_s25, 256  }
  0x58   : > { %1666 = vsyncadd (%p1858_p12), %s450_s25, 4294967040 }
  0x59   : > { %1668 = dma.done.wait (%p57_p1), [#allocation7], 256  }
  0x5a   : > { %1670 = vsyncadd (%p57_p1), [#allocation7], 4294967040 }
  0x5b   : > { %1672 = dma.done.wait (%p57_p1), [#allocation10], 512  }
  0x5c   : > { %1674 = vsyncadd (%p57_p1), [#allocation10], 4294966784 }
  0x5d   : > { %1676 = dma.done.wait (%p57_p1), [#allocation13], 256  }
  0x5e   : > { %1678 = vsyncadd (%p57_p1), [#allocation13], 4294967040  ;;  %v1273_v0 = vld [vmem:[#allocation9 + $0x8] sm:$0xff]  ;;  %v1272_v1 = vld [vmem:[#allocation9] sm:$0xff]  ;;  %vm549_vm0 = vcmask 261120   ;;  %s1711_s23 = smov 112  }
  0x5f   : > { %v526_v2 = vld [vmem:[%s453_s30] sm:$0xff]  ;;  %v527_v3 = vld [vmem:[%s453_s30 + $0x8] sm:$0xff]  ;;  %595 = vmatpush.bf16.msra.mxu1 %v1273_v0  ;;  %vm647_vm1 = vcmask 64512   ;;  %s1712_s2 = smov 120   ;;  %s1713_s4 = smov 104   ;;  %vm667_vm2 = vcmask 130048  }
  0x60   : > { %v1271_v4 = vld [vmem:[#allocation8 + $0x8] sm:$0xff]  ;;  %v1270_v5 = vld [vmem:[#allocation8] sm:$0xff]  ;;  %v524_v6 = vld [vmem:[%s443_s14] sm:$0xff]  ;;  %v528_v7 = vpack.c.bf16 %v527_v3, %v526_v2  ;;  %s1214_s27 = sshll.u32 %s1920_s28, 5  ;;  %s1714_s15 = smov 8  }
  0x61   : > { %559 = vmatpush.bf16.msra.mxu0 %v1271_v4  ;;  %v525_v8 = vpack.c.bf16 %v524_v6, %v524_v6  ;;  %v1275_v9 = vld [vmem:[#allocation11 + $0x8] sm:$0xff]  ;;  %v1274_v10 = vld [vmem:[#allocation11] sm:$0xff]  ;;  %s2006_s17 = scalar_lea.vmem [#allocation15], %s1214_s27  ;;  %s1715_s29 = smov 16  }
  0x62   : > { %629 = vmatpush.bf16.msra.mxu2 %v1275_v9  ;;  %v1388_v11 = vld [vmem:[%s2080_s3] ss:$0 sm:$0xff]  ;;  %s1716_s14 = smov 24   ;;  %s1278_s6 = sshll.u32 %s1802_s24, 5 }
  0x63   : > { %596 = vmatpush.bf16.msra.mxu1 %v1272_v1  ;;  %v1387_v13 = vld [vmem:[%s2082_s5] ss:$0 sm:$0xff]  ;;  %s1023_s30 = scalar_lea.hbm %s2088_s11, %s1278_s6  ;;  %s1024_s12 = sshll.u32 %s2006_s17, 4  ;;  %s1025_s12 = int_to_ptr.vmem [resolvable:$true] %s1024_s12 }
  0x64   : > { %v1389_v33 = vld [vmem:[%s2084_s7] ss:$0 sm:$0xff]  ;;  %s1026_s16 = sshll.u32 %s1023_s30, 4  ;;  %s998_s21 = scalar_lea.sflag [#allocation16], %s1920_s28  ;;  %s1027_s16 = int_to_ptr.hbm [resolvable:$true] %s1026_s16 }
  0x65   : > { %560 = vmatpush.bf16.msra.mxu0 %v1270_v5  ;;  %s1601_s13 = sshra.s32 %s1027_s16, 4  ;;  %s1607_s8 = scalar_lea.hbm %s2088_s11, 64  ;;  %s1602_s13 = int_to_ptr.hbm [resolvable:$true] %s1601_s13 }
  0x66   : > { %1232 = vmatmul.msk.bf16.vlgmr.msra.gmra.mxu1 %vm549_vm0, %v528_v7  ;;  %630 = vmatpush.bf16.msra.mxu2 %v1274_v10  ;;  %p1608_p7 = scmp.lt.s32.totalorder %s1602_s13, %s2088_s11 }
  0x68   : > { %1223 = vmatmul.msk.bf16.vlgmr.msra.gmra.mxu0 %vm549_vm0, %v525_v8 }
  0x69   : > { %1241 = vmatmul.msk.bf16.vlgmr.msra.gmra.mxu2 %vm549_vm0, %v528_v7 }
  0xe3   : > { %v598_v12 = vpop.f32.mrf.mxu1 }
  0xe4   : > { %v599_v17 = vadd.f32 %v1387_v13, %v598_v12 }
  0xe5   : > { %v562_v14 = vpop.f32.mrf.mxu0 }
  0xe6   : > { %v563_v15 = vadd.f32 %v1388_v11, %v562_v14  ;;  %v638_v21 = vpack.c.bf16 %v599_v17, %v599_v17 }
  0xe8   : > { %v637_v16 = vpack.c.bf16 %v563_v15, %v563_v15  ;;  %v644_v25 = vunpack.c.l.b16 %v638_v21 }
  0xea   : > { %v720_v18 = vunpack.c.l.b16 %v637_v16 }
  0xeb   : > { %v600_v20 = vpop.f32.mrf.mxu1 }
  0xec   : > { %v721_v19 = vpack.c.b16 %v720_v18, %v720_v18  ;;  %v601_v22 = vadd.f32 %v1387_v13, %v600_v20  ;;  %v632_v34 = vpop.f32.mrf.mxu2 }
  0xed   : > { %v564_v23 = vpop.f32.mrf.mxu0  ;;  %v633_v35 = vadd.f32 %v1389_v33, %v632_v34 }
  0xee   : > { %799 = vrot.lane.b32.xlu2 %v721_v19, %s1711_s23  ;;  %v639_v24 = vpack.c.bf16 %v601_v22, %v601_v22 }
  0xef   : > { %v640_v40 = vpack.c.bf16 %v633_v35, %v633_v35 }
  0xf0   : > { %v645_v26 = vunpack.c.l.b16 %v639_v24 }
  0xf1   : > { %v696_v43 = vunpack.c.l.b16 %v640_v40 }
  0xf2   : > { %v646_v27 = vpack.c.b16 %v645_v26, %v644_v25 }
  0xf4   : > { %801 = vrot.lane.b32.xlu1 %v646_v27, %s1711_s23  ;;  %724 = vrot.lane.b32.xlu0 %v646_v27, %s1712_s2  ;;  %v652_v28 = vsel %vm647_vm1, %v646_v27, 0  ;;  %v634_v41 = vpop.f32.mrf.mxu2 }
  0xf5   : > { %661 = vmatpush.bf16.xpose.msra.mxu3 %v652_v28  ;;  %v635_v42 = vadd.f32 %v1389_v33, %v634_v41 }
  0xf6   : > { %876 = vrot.lane.b32.xlu2 %v721_v19, %s1713_s4 }
  0xf7   : > { %v641_v44 = vpack.c.bf16 %v635_v42, %v635_v42 }
  0xf9   : > { %v697_v45 = vunpack.c.l.b16 %v641_v44 }
  0xfb   : > { %v698_v46 = vpack.c.b16 %v697_v45, %v696_v43 }
  0xfc   : > { %878 = vrot.lane.b32.xlu1 %v646_v27, %s1713_s4  ;;  %722 = vrot.lane.b32.xlu0 %v721_v19, %s1712_s2 }
  0xfd   : > { %1242 = vmatmul.msk.bf16.vlgmr.msra.gmra.mxu3 %vm647_vm1, %v637_v16  ;;  %710 = vmatpush.bf16.msrb.mxu0 %v698_v46 }
  0xfe   : > { %772 = vrot.lane.b32.xlu2 %v698_v46, %s1712_s2 }
 0x148   : > { %v800_v36 = vpop.permute.xlu2 %799 }
 0x150   : > { %v877_v47 = vpop.permute.xlu2 %876 }
 0x158   : > { %v773_v58 = vpop.permute.xlu2 %772 }
 0x159   : > { %785 = vmatpush.bf16.msrb.mxu2 %v773_v58 }
 0x166   : > { %v802_v29 = vpop.permute.xlu1 %801  ;;  %v725_v30 = vpop.permute.xlu0 %724 }
 0x167   : > { %v730_v31 = vsel %vm647_vm1, %v725_v30, 0  ;;  %v807_v32 = vsel %vm647_vm1, %v802_v29, 0 }
 0x168   : > { %739 = vmatpush.bf16.xpose.msrb.mxu1 %v730_v31  ;;  %816 = vmatpush.bf16.xpose.msrb.mxu3 %v807_v32 }
 0x16e   : > { %v879_v37 = vpop.permute.xlu1 %878  ;;  %v723_v38 = vpop.permute.xlu0 %722 }
 0x16f   : > { %v884_v39 = vsel %vm647_vm1, %v879_v37, 0  ;;  %1244 = vmatmul.msk.bf16.vlgmr.msrb.gmra.mxu1 %vm647_vm1, %v723_v38  ;;  %1247 = vmatmul.msk.bf16.vlgmr.msrb.gmra.mxu3 %vm647_vm1, %v800_v36 }
 0x170   : > { %893 = vmatpush.bf16.xpose.msra.mxu1 %v884_v39 }
 0x17f   : > { %1250 = vmatmul.msk.bf16.vlgmr.msra.gmra.mxu1 %vm647_vm1, %v877_v47 }
 0x180   : > { %v663_v48 = vpop.f32.mrf.mxu3 }
 0x181   : > { %v668_v49 = vsel %vm667_vm2, %v663_v48, -inf }
 0x182   : > { %669 = vmax.xlane.f32.xlu1 %v668_v49 }
 0x188   : > { %v665_v50 = vpop.f32.mrf.mxu3 }
 0x19b   : > { %926 = vrot.lane.b32.xlu1 %v698_v46, %s1713_s4 }
 0x1ec   : > { %v741_v51 = vpop.f32.mrf.mxu1 }
 0x1ed   : > { %v745_v52 = vsel %vm667_vm2, %v741_v51, -inf }
 0x1ee   : > { %746 = vmax.xlane.f32.xlu0 %v745_v52 }
 0x1f2   : > { %v818_v53 = vpop.f32.mrf.mxu3 }
 0x1f3   : > { %v822_v56 = vsel %vm667_vm2, %v818_v53, -inf }
 0x1f4   : > { %v743_v54 = vpop.f32.mrf.mxu1 }
 0x1f5   : > { %v670_v55 = vpop.xlane.xlu1 %669 }
 0x1f6   : > { %v671_v57 = vsub.f32 %v663_v48, %v670_v55  ;;  %823 = vmax.xlane.f32.xlu0 %v822_v56 }
 0x1f8   : > { %v672_v59 = vmul.f32 1.442695, %v671_v57 }
 0x1fa   : > { %1391 = vpow2.f32 %v672_v59  ;;  %v820_v60 = vpop.f32.mrf.mxu3 }
 0x1fc   : > { %v895_v61 = vpop.f32.mrf.mxu1 }
 0x1fd   : > { %v899_v62 = vsel %vm667_vm2, %v895_v61, -inf }
 0x1fe   : > { %900 = vmax.xlane.f32.xlu2 %v899_v62 }
 0x200   : > { %v1392_v63 = vpop.eup %1391 }
 0x201   : > { %v674_v0 = vsel %vm667_vm2, %v1392_v63, 0.0  ;;  %v693_v1 = vpack.c.bf16 %v1392_v63, %v1392_v63 }
 0x202   : > { %675 = vadd.xlane.f32.xlu1 %v674_v0 }
 0x203   : > { %1243 = vmatmul.msk.bf16.vlgmr.msrb.gmra.mxu0 %vm667_vm2, %v693_v1 }
 0x204   : > { %v897_v2 = vpop.f32.mrf.mxu1 }
 0x20d   : > { %v927_v3 = vpop.permute.xlu1 %926 }
 0x20e   : > { %939 = vmatpush.bf16.msra.mxu2 %v927_v3 }
 0x216   : > { %849 = vrot.lane.b32.xlu2 %v698_v46, %s1711_s23  ;;  %s1603_s23 = scalar_lea.hbm %s1602_s13, 32 }
 0x217   : > { %p1604_p1 = scmp.ne.s32.totalorder %s1602_s13, %s1603_s23  ;;  %p1609_p9 = scmp.lt.s32.totalorder %s1607_s8, %s1603_s23 }
 0x219   : > { %p1605_p3 = pnand %p1604_p1, %p1867_p4  ;;  %p1610_p5 = por %p1609_p9, %p1608_p7 }
 0x21b   : > { %p1606_p12 = pneg %p1605_p3 }
 0x21d   : > { %p1611_p8 = pnand %p1610_p5, %p1606_p12 }
 0x261   : > { %v747_v4 = vpop.xlane.xlu0 %746 }
 0x262   : > { %v748_v5 = vsub.f32 %v741_v51, %v747_v4 }
 0x264   : > { %v749_v6 = vmul.f32 1.442695, %v748_v5 }
 0x266   : > { %1393 = vpow2.f32 %v749_v6 }
 0x269   : > { %v824_v7 = vpop.xlane.xlu0 %823 }
 0x26a   : > { %v825_v8 = vsub.f32 %v818_v53, %v824_v7 }
 0x26c   : > { %v1983_v9 = vpop.eup %1393  ;;  %v826_v10 = vmul.f32 1.442695, %v825_v8 }
 0x26d   : > { %v751_v11 = vsel %vm667_vm2, %v1983_v9, 0.0  ;;  %v771_v12 = vpack.c.bf16 %v1983_v9, %v1983_v9 }
 0x26e   : > { %1395 = vpow2.f32 %v826_v10  ;;  %752 = vadd.xlane.f32.xlu0 %v751_v11 }
 0x26f   : > { %1246 = vmatmul.msk.bf16.vlgmr.msrb.gmra.mxu2 %vm667_vm2, %v771_v12 }
 0x271   : > { %v901_v13 = vpop.xlane.xlu2 %900 }
 0x272   : > { %v902_v14 = vsub.f32 %v895_v61, %v901_v13 }
 0x274   : > { %v1990_v15 = vpop.eup %1395  ;;  %v903_v16 = vmul.f32 1.442695, %v902_v14 }
 0x275   : > { %v676_v17 = vpop.xlane.xlu1 %675  ;;  %v828_v18 = vsel %vm667_vm2, %v1990_v15, 0.0  ;;  %v848_v20 = vpack.c.bf16 %v1990_v15, %v1990_v15 }
 0x276   : > { %1397 = vpow2.f32 %v903_v16  ;;  %829 = vadd.xlane.f32.xlu0 %v828_v18  ;;  %v688_v28 = vand.u32 2147483648, %v676_v17  ;;  %v686_v31 = vand.u32 2147483647, %v676_v17  ;;  %vm682_vm4 = vweird.f32 %v676_v17 }
 0x277   : > { %1399 = vrcp.f32 %v676_v17 }
 0x278   : > { %v689_v33 = vor.u32 1.1754944e-38, %v688_v28  ;;  %vm687_vm6 = vcmp.eq.f32.partialorder %v686_v31, 8.507059e+37 }
 0x279   : > { %v850_v19 = vpop.permute.xlu2 %849 }
 0x27a   : > { %862 = vmatpush.bf16.msra.mxu0 %v850_v19 }
 0x27c   : > { %v1996_v21 = vpop.eup %1397 }
 0x27d   : > { %v1400_v22 = vpop.eup %1399  ;;  %1249 = vmatmul.msk.bf16.vlgmr.msra.gmra.mxu0 %vm667_vm2, %v848_v20  ;;  %v905_v23 = vsel %vm667_vm2, %v1996_v21, 0.0  ;;  %v925_v24 = vpack.c.bf16 %v1996_v21, %v1996_v21  ;;  %v1277_v20 = vld [vmem:[#allocation12 + $0x8] sm:$0xff] }
 0x27e   : > { %v678_v25 = vmul.f32 %v1400_v22, %v676_v17  ;;  %906 = vadd.xlane.f32.xlu0 %v905_v23  ;;  %vm683_vm3 = vweird.f32 %v1400_v22  ;;  %984 = vmatpush.bf16.msra.mxu3 %v1277_v20 }
 0x27f   : > { %1252 = vmatmul.msk.bf16.vlgmr.msra.gmra.mxu2 %vm667_vm2, %v925_v24  ;;  %vm684_vm5 = vmor %vm682_vm4, %vm683_vm3 }
 0x280   : > { %v679_v26 = vsub.f32 1.0, %v678_v25  ;;  %v712_v27 = vpop.f32.mrf.mxu0 }
 0x281   : > { %v717_v29 = vmul.f32 %v1400_v22, %v712_v27 }
 0x282   : > { %v680_v30 = vmul.f32 %v1400_v22, %v679_v26 }
 0x283   : > { %718 = vst.msk [vmem:[#allocation2] sm:$0xff] %vm647_vm1, %v717_v29 }
 0x284   : > { %v681_v32 = vadd.f32 %v1400_v22, %v680_v30 }
 0x286   : > { %v685_v34 = vsel %vm684_vm5, %v1400_v22, %v681_v32  ;;  %vm797_vm5 = vcmask 130112   ;;  %v1276_v22 = vld [vmem:[#allocation12] sm:$0xff] }
 0x287   : > { %v690_v35 = vsel %vm687_vm6, %v689_v33, %v685_v34  ;;  %985 = vmatpush.bf16.msra.mxu3 %v1276_v22  ;;  %vm874_vm6 = vcmask 195712  }
 0x288   : > { %v691_v36 = vmul.f32 %v1392_v63, %v690_v35  ;;  %v714_v37 = vpop.f32.mrf.mxu0 }
 0x28a   : > { %692 = vst.msk [vmem:[%s2006_s17] sm:$0xff] %vm667_vm2, %v691_v36 }
 0x2e1   : > { %v753_v38 = vpop.xlane.xlu0 %752 }
 0x2e2   : > { %1401 = vrcp.f32 %v753_v38  ;;  %v765_v43 = vand.u32 2147483648, %v753_v38  ;;  %v763_v45 = vand.u32 2147483647, %v753_v38  ;;  %vm759_vm8 = vweird.f32 %v753_v38 }
 0x2e4   : > { %v766_v48 = vor.u32 1.1754944e-38, %v765_v43  ;;  %vm764_vm10 = vcmp.eq.f32.partialorder %v763_v45, 8.507059e+37 }
 0x2e8   : > { %v1402_v39 = vpop.eup %1401 }
 0x2e9   : > { %v755_v40 = vmul.f32 %v1402_v39, %v753_v38  ;;  %v830_v41 = vpop.xlane.xlu0 %829  ;;  %vm760_vm7 = vweird.f32 %v1402_v39 }
 0x2ea   : > { %1403 = vrcp.f32 %v830_v41  ;;  %vm761_vm9 = vmor %vm759_vm8, %vm760_vm7  ;;  %v842_v57 = vand.u32 2147483648, %v830_v41  ;;  %v840_v59 = vand.u32 2147483647, %v830_v41  ;;  %vm836_vm12 = vweird.f32 %v830_v41 }
 0x2eb   : > { %v756_v42 = vsub.f32 1.0, %v755_v40  ;;  %vm951_vm7 = vcmask 261312  }
 0x2ec   : > { %v843_v62 = vor.u32 1.1754944e-38, %v842_v57  ;;  %vm841_vm14 = vcmp.eq.f32.partialorder %v840_v59, 8.507059e+37 }
 0x2ed   : > { %v757_v44 = vmul.f32 %v1402_v39, %v756_v42 }
 0x2ef   : > { %v758_v46 = vadd.f32 %v1402_v39, %v757_v44 }
 0x2f0   : > { %v1404_v47 = vpop.eup %1403 }
 0x2f1   : > { %v762_v49 = vsel %vm761_vm9, %v1402_v39, %v758_v46  ;;  %v832_v50 = vmul.f32 %v1404_v47, %v830_v41  ;;  %v907_v51 = vpop.xlane.xlu0 %906  ;;  %vm837_vm11 = vweird.f32 %v1404_v47 }
 0x2f2   : > { %v767_v52 = vsel %vm764_vm10, %v766_v48, %v762_v49  ;;  %1405 = vrcp.f32 %v907_v51  ;;  %v787_v53 = vpop.f32.mrf.mxu2  ;;  %vm838_vm13 = vmor %vm836_vm12, %vm837_vm11  ;;  %v919_v7 = vand.u32 2147483648, %v907_v51  ;;  %vm913_vm1 = vweird.f32 %v907_v51 }
 0x2f3   : > { %v768_v54 = vmul.f32 %v1983_v9, %v767_v52  ;;  %v833_v55 = vsub.f32 1.0, %v832_v50  ;;  %v792_v56 = vmul.f32 %v1402_v39, %v787_v53  ;;  %v917_v9 = vand.u32 2147483647, %v907_v51 }
 0x2f4   : > { %v920_v11 = vor.u32 1.1754944e-38, %v919_v7 }
 0x2f5   : > { %1245 = vst.msk [vmem:[%s2006_s17 + $0x8] sm:$0xff] %vm667_vm2, %v768_v54  ;;  %v834_v58 = vmul.f32 %v1404_v47, %v833_v55  ;;  %794 = vrot.lane.b32.xlu2 %v792_v56, %s1714_s15  ;;  %vm918_vm4 = vcmp.eq.f32.partialorder %v917_v9, 8.507059e+37 }
 0x2f7   : > { %v835_v60 = vadd.f32 %v1404_v47, %v834_v58 }
 0x2f8   : > { %v1406_v61 = vpop.eup %1405 }
 0x2f9   : > { %v839_v63 = vsel %vm838_vm13, %v1404_v47, %v835_v60  ;;  %v909_v0 = vmul.f32 %v1406_v61, %v907_v51  ;;  %vm914_vm15 = vweird.f32 %v1406_v61 }
 0x2fa   : > { %v844_v1 = vsel %vm841_vm14, %v843_v62, %v839_v63  ;;  %v789_v2 = vpop.f32.mrf.mxu2  ;;  %v864_v3 = vpop.f32.mrf.mxu0  ;;  %vm915_vm3 = vmor %vm913_vm1, %vm914_vm15 }
 0x2fb   : > { %v845_v4 = vmul.f32 %v1990_v15, %v844_v1  ;;  %v910_v5 = vsub.f32 1.0, %v909_v0  ;;  %v869_v6 = vmul.f32 %v1404_v47, %v864_v3 }
 0x2fd   : > { %1248 = vst.msk [vmem:[%s2006_s17 + $0x10] sm:$0xff] %vm667_vm2, %v845_v4  ;;  %v911_v8 = vmul.f32 %v1406_v61, %v910_v5  ;;  %871 = vrot.lane.b32.xlu0 %v869_v6, %s1715_s29 }
 0x2ff   : > { %v912_v10 = vadd.f32 %v1406_v61, %v911_v8 }
 0x301   : > { %v916_v12 = vsel %vm915_vm3, %v1406_v61, %v912_v10 }
 0x302   : > { %v921_v13 = vsel %vm918_vm4, %v920_v11, %v916_v12  ;;  %v866_v14 = vpop.f32.mrf.mxu0  ;;  %v941_v15 = vpop.f32.mrf.mxu2 }
 0x303   : > { %v922_v16 = vmul.f32 %v1996_v21, %v921_v13  ;;  %v946_v17 = vmul.f32 %v1406_v61, %v941_v15 }
 0x305   : > { %1251 = vst.msk [vmem:[%s2006_s17 + $0x18] sm:$0xff] %vm667_vm2, %v922_v16  ;;  %948 = vrot.lane.b32.xlu2 %v946_v17, %s1716_s14 }
 0x30a   : > { %v943_v18 = vpop.f32.mrf.mxu2 }
 0x34f   : > { %v795_v19 = vpop.permute.xlu2 %794 }
 0x350   : > { %798 = vst.msk [vmem:[#allocation2] sm:$0xff] %vm797_vm5, %v795_v19 }
 0x35f   : > { %v949_v21 = vpop.permute.xlu2 %948 }
 0x36f   : > { %v872_v23 = vpop.permute.xlu0 %871 }
 0x370   : > { %875 = vst.msk [vmem:[#allocation2] sm:$0xff] %vm874_vm6, %v872_v23 }
 0x371   : > { %952 = vst.msk [vmem:[#allocation2] sm:$0xff] %vm951_vm7, %v949_v21 }
 0x378   : > { %v953_v24 = vld [vmem:[#allocation2] sm:$0xff] }
 0x379   : > { %v954_v25 = vpack.c.bf16 %v953_v24, %v953_v24 }
 0x37b   : > { %1261 = vmatmul.msk.bf16.vlgmr.msra.gmra.mxu3 %vm549_vm0, %v954_v25 }
 0x37c   : > { %1614 = shalt.err (!%p1611_p8)
}
 0x37d   : > { %s1717_s17 = smov 128   ;;  %s1264_s29 = sshll.u32 %s1802_s24, 3 }
 0x37e   : > { %1300 = dma.vmem_to_hbm [thread:$0]  (%p1867_p4), %s1025_s12, 512, %s1027_s16, %s998_s21, %s1717_s17, %s1717_s17, %s1714_s15  }
 0x37f   : > { %s1008_s9 = scalar_lea.hbm %s2087_s10, %s1264_s29  ;;  %s2115_s13 = sld [smem:[#allocation33_spill]] }
 0x380   : > { %s515_s23 = scalar_lea.vmem [#allocation14], %s1207_s22  ;;  %s1012_s4 = sshll.u32 %s1008_s9, 4  ;;  %s1013_s4 = int_to_ptr.hbm [resolvable:$true] %s1012_s4 }
 0x381   : > { %s1010_s2 = sshll.u32 %s515_s23, 4  ;;  %s993_s24 = scalar_lea.sflag [#allocation5], %s1920_s28  ;;  %s1011_s2 = int_to_ptr.vmem [resolvable:$true] %s1010_s2 }
 0x382   : > { %s1629_s15 = sshra.s32 %s1013_s4, 4  ;;  %s1635_s22 = scalar_lea.hbm %s2087_s10, 16  ;;  %s1630_s15 = int_to_ptr.hbm [resolvable:$true] %s1629_s15 }
 0x383   : > { %s1631_s12 = scalar_lea.hbm %s1630_s15, 8  ;;  %p1636_p0 = scmp.lt.s32.totalorder %s1630_s15, %s2087_s10 }
 0x384   : > { %p1632_p10 = scmp.ne.s32.totalorder %s1630_s15, %s1631_s12  ;;  %p1637_p2 = scmp.lt.s32.totalorder %s1635_s22, %s1631_s12 }
 0x385   : > { %v1390_v26 = vld [vmem:[%s2115_s13] ss:$0 sm:$0xff] }
 0x386   : > { %p1633_p13 = pnand %p1632_p10, %p1867_p4  ;;  %p1638_p1 = por %p1637_p2, %p1636_p0 }
 0x388   : > { %p1634_p11 = pneg %p1633_p13 }
 0x38a   : > { %p1639_p3 = pnand %p1638_p1, %p1634_p11 }
 0x3fe   : > { %v987_v27 = vpop.f32.mrf.mxu3 }
 0x3ff   : > { %v988_v28 = vadd.f32 %v1390_v26, %v987_v27 }
 0x401   : > { %991 = vst.msk [vmem:[%s515_s23] sm:$0xff] %vm549_vm0, %v988_v28 }
 0x402   : > { %1642 = shalt.err (!%p1639_p3)
}
 0x403   : > { %1299 = dma.vmem_to_hbm [thread:$0]  (%p1867_p4), %s1011_s2, 128, %s1013_s4, %s993_s24  }
 0x406   : > { %v989_v29 = vpop.f32.mrf.mxu3 }
 0x407 PF: > { %s2116_s28 = sld [smem:[#allocation24_spill]]  ;;  %p2118_p12 = scmp.ge.s32.totalorder %s1701_s20, 2 }
 0x409   : > { %p1324_p7 = pnand %p2118_p12, %p1871_p6 }
 0x40b   : > { %p1325_p9 = pneg %p1324_p7 }
 0x40d   : > { %s1041_s17 = sand.u32 1, %s2116_s28  }
 0x40e   : > { %s1042_s29 = scalar_lea.sflag [#allocation5], %s1041_s17 }
 0x40f   : > { %1680 = dma.done.wait (%p1325_p9), %s1042_s29, 128  }
 0x410   : > { %1682 = vsyncadd (%p1325_p9), %s1042_s29, 4294967168  ;;  %s1052_s14 = scalar_lea.sflag [#allocation16], %s1041_s17 }
 0x411   : > { %1684 = dma.done.wait (%p1325_p9), %s1052_s14, 512  }
 0x412   : > { %1686 = vsyncadd (%p1325_p9), %s1052_s14, 4294966784  ;;  %s2119_s20 = sld [smem:[#allocation26_spill]]  ;;  %s2122_s17 = smov %s1693_s18 }
 0x413   : > { %s2120_s26 = sld [smem:[#allocation25_spill]] }
 0x414   : > { %s2121_s19 = sld [smem:[#allocation27_spill]] }
 0x418   : > { %p33_p4 = scmp.ge.s32.totalorder %s2119_s20, 4  }
 0x419   : > { %s2123_s18 = smov %s2120_s26 }
 0x41a   :  { %35 = sbr.rel (!%p33_p4) target bundleno = 17 (0x11), region = 154 }
 0x41f   :  { %1058 = vsyncpa [#allocation4], 1 }
 0x420   :  { %1060 = vsyncpa [#allocation4 + $0x1], 1 }
 0x421   :  { %1061 = vsyncpa [#allocation7], 1 }
 0x422   :  { %1063 = vsyncpa [#allocation7 + $0x1], 1 }
 0x423   :  { %1064 = vsyncpa [#allocation10], 1 }
 0x424   :  { %1065 = vsyncpa [#allocation13], 1 }
 0x425   :  { %1066 = vsyncpa [#allocation5], 1 }
 0x426   :  { %1068 = vsyncpa [#allocation5 + $0x1], 1 }
 0x427   :  { %1069 = vsyncpa [#allocation16], 1 }
 0x428   :  { %1071 = vsyncpa [#allocation16 + $0x1], 1 }

</bundles_post_ra>
